<compile_context>
chip_gen: v6e
topology: v6e:2x2x1
jax: 0.10.0
libtpu: 0.0.40
codegen_flags: <defaults>
</compile_context>

<pallas_src>
import jax
import jax.numpy as jnp
from jax.experimental import pallas as pl
from jax.experimental.pallas import tpu as pltpu


def mlp_kernel(params_ref, xt_ref, o_ref):
    """Computes one batch block on the VPU only.

    params_ref : SMEM f32[11] -- packed [w1 (2x3 row-major), b1 (2), w2 (2), b2 (1)]
    xt_ref     : VMEM f32[3, BN] -- features on sublanes, batch on lanes
    o_ref      : VMEM f32[1, BN] -- lane-dense output row
    """
    # Feature rows of the transposed input, kept 2-D: (1, BN) each.
    x0 = xt_ref[0:1, :]
    x1 = xt_ref[1:2, :]
    x2 = xt_ref[2:3, :]

    # Scalar weights/biases from SMEM (cheap scalar loads, no vector DMA).
    w1_00 = params_ref[0]
    w1_01 = params_ref[1]
    w1_02 = params_ref[2]
    w1_10 = params_ref[3]
    w1_11 = params_ref[4]
    w1_12 = params_ref[5]
    b1_0 = params_ref[6]
    b1_1 = params_ref[7]
    w2_0 = params_ref[8]
    w2_1 = params_ref[9]
    b2_0 = params_ref[10]

    # Hidden layer (2 neurons) as unrolled VPU FMAs + ReLU.
    h0 = jnp.maximum(x0 * w1_00 + x1 * w1_01 + x2 * w1_02 + b1_0, 0.0)
    h1 = jnp.maximum(x0 * w1_10 + x1 * w1_11 + x2 * w1_12 + b1_1, 0.0)

    # Output layer (1 neuron).
    o = h0 * w2_0 + h1 * w2_1 + b2_0
    o_ref[...] = o.astype(o_ref.dtype)


def my_model_forward(x, w1, b1, w2, b2, *, block_n=512):
    """x: (N, 3) f32; w1: (2, 3); b1: (2,); w2: (1, 2); b2: (1,). Returns (N, 1)."""
    n, f = x.shape
    assert f == 3, "MyModel expects 3 input features"
    assert block_n % 128 == 0, "block_n must be lane-aligned (multiple of 128)"

    # Pack every parameter into one f32 vector -> a single SMEM transfer.
    params = jnp.concatenate(
        [w1.reshape(-1), b1.reshape(-1), w2.reshape(-1), b2.reshape(-1)]
    ).astype(jnp.float32)  # (11,)

    # Transposed, lane-dense layout: batch on lanes, features on sublanes.
    # Pad the batch axis to a multiple of block_n (padded columns are sliced
    # off after the kernel; their values are harmless finite numbers).
    n_blocks = pl.cdiv(n, block_n)
    n_pad = n_blocks * block_n
    xt = jnp.zeros((3, n_pad), x.dtype).at[:, :n].set(x.T)

    out_t = pl.pallas_call(
        mlp_kernel,
        out_shape=jax.ShapeDtypeStruct((1, n_pad), x.dtype),
        grid=(n_blocks,),
        in_specs=[
            # All weights/biases live in SMEM for the whole grid (one copy).
            pl.BlockSpec(memory_space=pltpu.MemorySpace.SMEM),
            # (3, block_n) tile of the transposed input per grid step.
            pl.BlockSpec((3, block_n), lambda i: (0, i)),
        ],
        out_specs=pl.BlockSpec((1, block_n), lambda i: (0, i)),
        compiler_params=pltpu.CompilerParams(
            dimension_semantics=("parallel",),
        ),
    )(params, xt)

    # Back to the PyTorch-shaped (N, 1) output.
    return out_t[0, :n].reshape(n, 1)


def init_params(key):
    # Deterministic init mimicking PyTorch nn.Linear default:
    # U(-1/sqrt(fan_in), 1/sqrt(fan_in)) for both weight and bias.
    k1, k2, k3, k4 = jax.random.split(key, 4)
    bound1 = 1.0 / jnp.sqrt(3.0)
    w1 = jax.random.uniform(k1, (2, 3), jnp.float32, -bound1, bound1)
    b1 = jax.random.uniform(k2, (2,), jnp.float32, -bound1, bound1)
    bound2 = 1.0 / jnp.sqrt(2.0)
    w2 = jax.random.uniform(k3, (1, 2), jnp.float32, -bound2, bound2)
    b2 = jax.random.uniform(k4, (1,), jnp.float32, -bound2, bound2)
    return w1, b1, w2, b2


if __name__ == "__main__":
    key = jax.random.PRNGKey(0)
    k_x, k_p = jax.random.split(key)

    # Same shape as the reference script: x = torch.randn((4, 3)).
    # NOTE: at N=4 this call is pure launch/DMA overhead; the Pallas path pays
    # off for large batches (the grid tiles N in lane-dense blocks).
    x = jax.random.normal(k_x, (4, 3), dtype=jnp.float32)
    w1, b1, w2, b2 = init_params(k_p)

    out = my_model_forward(x, w1, b1, w2, b2, block_n=128)
    out = jax.block_until_ready(out)

    # Pure-JAX reference check.
    ref = jnp.maximum(x @ w1.T + b1, 0.0) @ w2.T + b2
    assert out.shape == (4, 1)
    assert jnp.allclose(out, ref, atol=1e-5), "mismatch vs. reference"

    # Also sanity-check a larger, non-multiple-of-block batch through the grid.
    x_big = jax.random.normal(k_x, (1000, 3), dtype=jnp.float32)
    out_big = jax.block_until_ready(my_model_forward(x_big, w1, b1, w2, b2))
    ref_big = jnp.maximum(x_big @ w1.T + b1, 0.0) @ w2.T + b2
    assert out_big.shape == (1000, 1)
    assert jnp.allclose(out_big, ref_big, atol=1e-5), "mismatch vs. reference (big)"

    print("KERNEL_OK")
</pallas_src>

<mosaic_0001>
module attributes {stable_mosaic.version = 11 : i64} {
  func.func @mlp_kernel(%arg0: i32, %arg1: memref<11xf32, #tpu.memory_space<smem>>, %arg2: memref<3x128xf32, #tpu.memory_space<vmem>>, %arg3: memref<1x128xf32, #tpu.memory_space<vmem>>) attributes {dimension_semantics = [#tpu.dimension_semantics<parallel>], iteration_bounds = array<i64: 1>, scalar_prefetch = 0 : i64, scratch_operands = 0 : i64, tpu.core_type = #tpu.core_type<tc>, window_params = [{transform_indices = @transform_0, window_bounds = array<i64: 11>}, {transform_indices = @transform_1, window_bounds = array<i64: 3, 128>}, {transform_indices = @transform_2, window_bounds = array<i64: 1, 128>}]} {
    %c0 = arith.constant 0 : index
    %c0_0 = arith.constant 0 : index
    %0 = vector.load %arg2[%c0, %c0_0] : memref<3x128xf32, #tpu.memory_space<vmem>>, vector<1x128xf32>
    %c1 = arith.constant 1 : index
    %c0_1 = arith.constant 0 : index
    %1 = vector.load %arg2[%c1, %c0_1] : memref<3x128xf32, #tpu.memory_space<vmem>>, vector<1x128xf32>
    %c2 = arith.constant 2 : index
    %c0_2 = arith.constant 0 : index
    %2 = vector.load %arg2[%c2, %c0_2] : memref<3x128xf32, #tpu.memory_space<vmem>>, vector<1x128xf32>
    %c0_3 = arith.constant 0 : index
    %3 = memref.load %arg1[%c0_3] : memref<11xf32, #tpu.memory_space<smem>>
    %c1_4 = arith.constant 1 : index
    %4 = memref.load %arg1[%c1_4] : memref<11xf32, #tpu.memory_space<smem>>
    %c2_5 = arith.constant 2 : index
    %5 = memref.load %arg1[%c2_5] : memref<11xf32, #tpu.memory_space<smem>>
    %c3 = arith.constant 3 : index
    %6 = memref.load %arg1[%c3] : memref<11xf32, #tpu.memory_space<smem>>
    %c4 = arith.constant 4 : index
    %7 = memref.load %arg1[%c4] : memref<11xf32, #tpu.memory_space<smem>>
    %c5 = arith.constant 5 : index
    %8 = memref.load %arg1[%c5] : memref<11xf32, #tpu.memory_space<smem>>
    %c6 = arith.constant 6 : index
    %9 = memref.load %arg1[%c6] : memref<11xf32, #tpu.memory_space<smem>>
    %c7 = arith.constant 7 : index
    %10 = memref.load %arg1[%c7] : memref<11xf32, #tpu.memory_space<smem>>
    %c8 = arith.constant 8 : index
    %11 = memref.load %arg1[%c8] : memref<11xf32, #tpu.memory_space<smem>>
    %c9 = arith.constant 9 : index
    %12 = memref.load %arg1[%c9] : memref<11xf32, #tpu.memory_space<smem>>
    %c10 = arith.constant 10 : index
    %13 = memref.load %arg1[%c10] : memref<11xf32, #tpu.memory_space<smem>>
    %14 = vector.broadcast %3 : f32 to vector<1x128xf32>
    %15 = arith.mulf %0, %14 : vector<1x128xf32>
    %16 = vector.broadcast %4 : f32 to vector<1x128xf32>
    %17 = arith.mulf %1, %16 : vector<1x128xf32>
    %18 = arith.addf %15, %17 : vector<1x128xf32>
    %19 = vector.broadcast %5 : f32 to vector<1x128xf32>
    %20 = arith.mulf %2, %19 : vector<1x128xf32>
    %21 = arith.addf %18, %20 : vector<1x128xf32>
    %22 = vector.broadcast %9 : f32 to vector<1x128xf32>
    %23 = arith.addf %21, %22 : vector<1x128xf32>
    %cst = arith.constant 0.000000e+00 : f32
    %24 = vector.broadcast %cst : f32 to vector<1x128xf32>
    %25 = arith.maximumf %23, %24 : vector<1x128xf32>
    %26 = vector.broadcast %6 : f32 to vector<1x128xf32>
    %27 = arith.mulf %0, %26 : vector<1x128xf32>
    %28 = vector.broadcast %7 : f32 to vector<1x128xf32>
    %29 = arith.mulf %1, %28 : vector<1x128xf32>
    %30 = arith.addf %27, %29 : vector<1x128xf32>
    %31 = vector.broadcast %8 : f32 to vector<1x128xf32>
    %32 = arith.mulf %2, %31 : vector<1x128xf32>
    %33 = arith.addf %30, %32 : vector<1x128xf32>
    %34 = vector.broadcast %10 : f32 to vector<1x128xf32>
    %35 = arith.addf %33, %34 : vector<1x128xf32>
    %cst_6 = arith.constant 0.000000e+00 : f32
    %36 = vector.broadcast %cst_6 : f32 to vector<1x128xf32>
    %37 = arith.maximumf %35, %36 : vector<1x128xf32>
    %38 = vector.broadcast %11 : f32 to vector<1x128xf32>
    %39 = arith.mulf %25, %38 : vector<1x128xf32>
    %40 = vector.broadcast %12 : f32 to vector<1x128xf32>
    %41 = arith.mulf %37, %40 : vector<1x128xf32>
    %42 = arith.addf %39, %41 : vector<1x128xf32>
    %43 = vector.broadcast %13 : f32 to vector<1x128xf32>
    %44 = arith.addf %42, %43 : vector<1x128xf32>
    %c0_7 = arith.constant 0 : index
    %c0_8 = arith.constant 0 : index
    %45 = vector.load %arg3[%c0_7, %c0_8] : memref<1x128xf32, #tpu.memory_space<vmem>>, vector<1x128xf32>
    tpu.vector_store %arg3[%c0_7, %c0_8], %44 {strides = array<i32>} : memref<1x128xf32, #tpu.memory_space<vmem>>, vector<1x128xf32>,
    return
  }
  func.func @transform_0(%arg0: i32) -> i32 {
    %c0_i32 = arith.constant 0 : i32
    %c0_i32_0 = arith.constant 0 : i32
    return %c0_i32 : i32
  }
  func.func @transform_1(%arg0: i32) -> (i32, i32) {
    %c0_i32 = arith.constant 0 : i32
    %c0_i32_0 = arith.constant 0 : i32
    return %c0_i32, %arg0 : i32, i32
  }
  func.func @transform_2(%arg0: i32) -> (i32, i32) {
    %c0_i32 = arith.constant 0 : i32
    %c0_i32_0 = arith.constant 0 : i32
    return %c0_i32, %arg0 : i32, i32
  }
}

</mosaic_0001>

<bundles_post_ra>
// kernel: tpu_custom_call.1
= control target key start
LH: loop header
LB: loop body
LE: loop exit
PB: predicated region body
PF: predicated region fallthrough
CT: control target
= control target key end

     0   :  { %7 = vsyncpa [#allocation5], 0  ;;  %s189_s0 = inlined_call_operand.hbm [shape: f32[11], index: 0, kind: input, shape index: {}]   ;;  %s190_s1 = inlined_call_operand.hbm [shape: f32[3,128], index: 1, kind: input, shape index: {}]   ;;  %s191_s2 = inlined_call_operand.hbm [shape: f32[1,128], index: 2, kind: output, shape index: {}]  }
   0x1   :  { %8 = vsyncpa [#allocation3], 0 }
   0x2   :  { %9 = vsyncpa [#allocation4], 0  ;;  %s162_s9 = smov [#allocation2]   ;;  %s163_s12 = smov [#allocation6]  }
   0x3   :  { %17 = dma.hbm_to_smem %s189_s0, 16, %s162_s9, [#allocation5]  }
   0x4   :  { %s24_s13 = sshll.u32 %s163_s12, 4  ;;  %s25_s13 = int_to_ptr.vmem [resolvable:$true] %s24_s13 }
   0x5   :  { %s124_s14 = scalar_lea.vmem %s25_s13, 64  ;;  %p129_p1 = scmp.lt.s32.totalorder %s25_s13, %s25_s13 }
   0x6   :  { %p125_p0 = scmp.ne.s32.totalorder %s25_s13, %s124_s14  ;;  %p130_p2 = scmp.lt.s32.totalorder %s124_s14, %s124_s14 }
   0x8   :  { %p131_p3 = por %p130_p2, %p129_p1 }
   0xa   :  { %p132_p4 = pnand %p131_p3, %p125_p0 }
   0xc   :  { %135 = shalt.err (!%p132_p4)
}
   0xd   :  { %27 = dma.hbm_to_vmem [thread:$0]  %s190_s1, 64, %s25_s13, [#allocation3]  }
   0xe   :  { %156 = dma.done.wait [#allocation5], 16  }
   0xf   :  { %157 = vsyncadd [#allocation5], 4294967280 }
  0x10   :  { %158 = dma.done.wait [#allocation3], 64  }
  0x11   :  { %159 = vsyncadd [#allocation3], 4294967232 }
  0x12   :  { %34 = sfence }
  0x13   :  { %s38_s0 = sld [smem:[#allocation2]]  ;;  %v35_v0 = vld [vmem:[#allocation6] sm:$0x1]  ;;  %v36_v1 = vld [vmem:[#allocation6 + $0x1] sm:$0x1]  ;;  %s164_s26 = smov [#allocation7]  }
  0x14   :  { %s95_s17 = sld [smem:[#allocation2 + $0x1]]  ;;  %v37_v2 = vld [vmem:[#allocation6 + $0x2] sm:$0x1]  ;;  %s85_s27 = sshll.u32 %s164_s26, 4  ;;  %s86_s27 = int_to_ptr.vmem [resolvable:$true] %s85_s27 }
  0x15   :  { %s96_s18 = sld [smem:[#allocation2 + $0x2]]  ;;  %s136_s28 = scalar_lea.vmem %s86_s27, 16 }
  0x16   :  { %s97_s19 = sld [smem:[#allocation2 + $0x3]]  ;;  %p137_p5 = scmp.ne.s32.totalorder %s86_s27, %s136_s28 }
  0x17   :  { %s98_s20 = sld [smem:[#allocation2 + $0x4]]  ;;  %s140_s29 = scalar_lea.vmem %s86_s27, 32 }
  0x18   :  { %s99_s21 = sld [smem:[#allocation2 + $0x5]]  ;;  %p141_p6 = scmp.lt.s32.totalorder %s86_s27, %s86_s27 }
  0x19   :  { %s100_s22 = sld [smem:[#allocation2 + $0x6]]  ;;  %v49_v3 = vstv %s38_s0  ;;  %p142_p7 = scmp.lt.s32.totalorder %s140_s29, %s136_s28 }
  0x1a   :  { %s101_s23 = sld [smem:[#allocation2 + $0x7]]  ;;  %v50_v4 = vmul.f32 %v49_v3, %v35_v0  ;;  %v51_v5 = vstv %s95_s17 }
  0x1b   :  { %s102_s1 = sld [smem:[#allocation2 + $0x8]]  ;;  %v52_v6 = vmul.f32 %v51_v5, %v36_v1  ;;  %v54_v7 = vstv %s96_s18  ;;  %p143_p8 = por %p142_p7, %p141_p6 }
  0x1c   :  { %v55_v8 = vmul.f32 %v54_v7, %v37_v2  ;;  %v60_v9 = vstv %s97_s19  ;;  %s103_s24 = sld [smem:[#allocation2 + $0x9]] }
  0x1d   :  { %v53_v10 = vadd.f32 %v52_v6, %v50_v4  ;;  %v61_v11 = vmul.f32 %v60_v9, %v35_v0  ;;  %v62_v12 = vstv %s98_s20  ;;  %s104_s25 = sld [smem:[#allocation2 + $0xa]]  ;;  %p144_p9 = pnand %p143_p8, %p137_p5 }
  0x1e   :  { %v63_v13 = vmul.f32 %v62_v12, %v36_v1  ;;  %v65_v14 = vstv %s99_s21 }
  0x1f   :  { %v56_v15 = vadd.f32 %v55_v8, %v53_v10  ;;  %v57_v16 = vstv %s100_s22  ;;  %v66_v17 = vmul.f32 %v65_v14, %v37_v2 }
  0x20   :  { %v64_v18 = vadd.f32 %v63_v13, %v61_v11  ;;  %v68_v20 = vstv %s101_s23 }
  0x21   :  { %v58_v19 = vadd.f32 %v57_v16, %v56_v15  ;;  %v71_v23 = vstv %s102_s1 }
  0x22   :  { %v67_v21 = vadd.f32 %v66_v17, %v64_v18  ;;  %v73_v25 = vstv %s103_s24 }
  0x23   :  { %v59_v22 = vmax.f32 %v58_v19, 0.0  ;;  %v76_v29 = vstv %s104_s25 }
  0x24   :  { %v69_v24 = vadd.f32 %v68_v20, %v67_v21 }
  0x25   :  { %v72_v27 = vmul.f32 %v71_v23, %v59_v22 }
  0x26   :  { %v70_v26 = vmax.f32 %v69_v24, 0.0 }
  0x28   :  { %v74_v28 = vmul.f32 %v73_v25, %v70_v26 }
  0x2a   :  { %v75_v30 = vadd.f32 %v74_v28, %v72_v27 }
  0x2c   :  { %v77_v31 = vadd.f32 %v76_v29, %v75_v30 }
  0x2e   :  { %78 = vst [vmem:[#allocation7] sm:$0x1] %v77_v31 }
  0x2f   :  { %147 = shalt.err (!%p144_p9)
}
  0x30   :  { %88 = dma.vmem_to_hbm [thread:$0]  %s86_s27, 16, %s191_s2, [#allocation4]  }
  0x31   :  { %160 = dma.done.wait [#allocation4], 16  }
  0x32   :  { %161 = vsyncadd [#allocation4], 4294967280 }
  0x33   :  { %92 = vsyncpa [#allocation3], 1 }
  0x34   :  { %93 = vsyncpa [#allocation4], 1 }
  0x35   :  { %94 = vsyncpa [#allocation5], 1 }

</bundles_post_ra>
